<compile_context>
chip_gen: v5e
topology: v5e:2x2
jax: 0.10.0
libtpu: 0.0.40
codegen_flags: <defaults>
</compile_context>

<pallas_src>
import functools

import jax
import jax.numpy as jnp
from jax.experimental import pallas as pl
from jax.experimental.pallas import tpu as pltpu


# --------------------------------------------------------------------------- #
# Kernel                                                                      #
# --------------------------------------------------------------------------- #
def _ffn_kernel(x_ref, w1_ref, b1_ref, w2_ref, b2_ref, out_ref):
    k = pl.program_id(1)

    # Cast the resident f32 row tile to bf16 on the VPU (hidden under the MXU)
    # instead of paying an extra un-fused HBM pass in the wrapper.
    x = x_ref[...].astype(jnp.bfloat16)

    # fc1 (bf16 x bf16 -> f32 accumulate) + bias + ReLU for this d_ff block.
    h = jnp.dot(x, w1_ref[...], preferred_element_type=jnp.float32)
    h = jnp.maximum(h + b1_ref[...], 0.0)

    # fc2 partial product for this d_ff block.
    partial = jnp.dot(h.astype(w2_ref.dtype), w2_ref[...],
                      preferred_element_type=jnp.float32)

    # Accumulate directly into the (f32, block-resident) output tile.
    @pl.when(k == 0)
    def _():
        out_ref[...] = partial

    @pl.when(k != 0)
    def _():
        out_ref[...] += partial

    @pl.when(k == pl.num_programs(1) - 1)
    def _():
        out_ref[...] += b2_ref[...]


# --------------------------------------------------------------------------- #
# Tile selection / VMEM budgeting                                             #
# --------------------------------------------------------------------------- #
def _round_up(n, m):
    return ((n + m - 1) // m) * m


def _footprint_bytes(tile_m, tile_f, d_model):
    """Per-step VMEM footprint with double-buffered pipelined operands."""
    return (2 * tile_m * d_model * 4        # x tiles (f32, double-buffered)
            + 2 * d_model * tile_f * 2      # w1 tiles (bf16)
            + 2 * tile_f * d_model * 2      # w2 tiles (bf16)
            + 2 * 8 * tile_f * 4            # b1 tiles (f32, sublane-padded)
            + 2 * 8 * d_model * 4           # b2 tiles
            + 2 * tile_m * d_model * 4      # out tiles (f32, block-resident)
            + tile_m * tile_f * 4)          # hidden slab intermediate (f32)


def _vmem_budget_bytes():
    """Generation-aware tile budget (physical VMEM minus compiler headroom)."""
    try:
        cap = pltpu.get_tpu_info().vmem_capacity_bytes
    except Exception:  # CPU / interpret / unknown part
        cap = 128 << 20
    if cap <= (64 << 20):      # v7x: 64 MiB physical -> leave scratch headroom
        return 48 << 20
    return 100 << 20           # v5e / v6e: 128 MiB physical


def _select_tiles(m_rows, d_model, d_ff_p, budget):
    """Largest tile_m (then tile_f) whose footprint fits the VMEM budget."""
    m_cap = _round_up(max(m_rows, 8), 8)
    m_cands = [c for c in (2048, 1024, 768, 512, 384, 256, 128, 64, 32, 16, 8)
               if c <= m_cap]
    if not m_cands:
        m_cands = [m_cap]
    f_cands = [c for c in (1024, 512, 256, 128) if d_ff_p % c == 0]
    if not f_cands:
        f_cands = [d_ff_p]
    for tm in m_cands:                      # prioritize big row tiles
        for tf in f_cands:
            if _footprint_bytes(tm, tf, d_model) <= budget:
                return tm, tf
    return m_cands[-1], f_cands[-1]


# --------------------------------------------------------------------------- #
# One-time parameter preparation (hoisted out of the per-call path)           #
# --------------------------------------------------------------------------- #
def prepare_ffn_params(params):
    """Convert weights to bf16 and pad d_ff up to a multiple of 128, ONCE.

    Zero-padded w1 columns / b1 entries give relu(0) = 0 hidden activations,
    which meet zero-padded w2 rows -> no effect on the output.
    """
    w1 = jnp.asarray(params["w1"])
    b1 = jnp.asarray(params["b1"])
    w2 = jnp.asarray(params["w2"])
    b2 = jnp.asarray(params["b2"])
    d_model, d_ff = w1.shape
    d_ff_p = _round_up(d_ff, 128)
    if d_ff_p != d_ff:
        pad = d_ff_p - d_ff
        w1 = jnp.pad(w1, ((0, 0), (0, pad)))
        b1 = jnp.pad(b1, ((0, pad),))
        w2 = jnp.pad(w2, ((0, pad), (0, 0)))
    return {
        "w1": w1.astype(jnp.bfloat16),                      # [D, d_ff_p]
        "b1": b1.reshape(1, d_ff_p).astype(jnp.float32),    # [1, d_ff_p]
        "w2": w2.astype(jnp.bfloat16),                      # [d_ff_p, D]
        "b2": b2.reshape(1, d_model).astype(jnp.float32),   # [1, D]
        "d_model": d_model,
        "d_ff": d_ff,
        "d_ff_padded": d_ff_p,
    }


# --------------------------------------------------------------------------- #
# Wrapper                                                                     #
# --------------------------------------------------------------------------- #
@functools.partial(jax.jit, static_argnames=())
def _ffn_call(x2, w1, b1, w2, b2):
    m_pad, d_model = x2.shape
    d_ff_p = w1.shape[1]

    budget = _vmem_budget_bytes()
    tile_m, tile_f = _select_tiles(m_pad, d_model, d_ff_p, budget)
    # x2 is already padded to a multiple of tile_m by the caller.
    grid_m = m_pad // tile_m
    grid_k = d_ff_p // tile_f

    footprint = _footprint_bytes(tile_m, tile_f, d_model)
    vmem_limit = int(max(16 << 20, min(footprint + (8 << 20), budget + (8 << 20))))

    # Advisory cost estimate: 2 matmuls of 2*M*D*d_ff flops each; weights are
    # re-streamed once per row tile.
    weight_bytes = 2 * d_model * d_ff_p * 2 + (d_ff_p + d_model) * 4
    cost = pl.CostEstimate(
        flops=4 * m_pad * d_model * d_ff_p,
        transcendentals=0,
        bytes_accessed=2 * m_pad * d_model * 4 + weight_bytes * grid_m,
    )

    return pl.pallas_call(
        _ffn_kernel,
        out_shape=jax.ShapeDtypeStruct((m_pad, d_model), jnp.float32),
        grid_spec=pltpu.PrefetchScalarGridSpec(
            num_scalar_prefetch=0,
            grid=(grid_m, grid_k),
            in_specs=[
                pl.BlockSpec((tile_m, d_model), lambda i, k: (i, 0)),   # x rows
                pl.BlockSpec((d_model, tile_f), lambda i, k: (0, k)),   # w1 block
                pl.BlockSpec((1, tile_f), lambda i, k: (0, k)),         # b1 block
                pl.BlockSpec((tile_f, d_model), lambda i, k: (k, 0)),   # w2 block
                pl.BlockSpec((1, d_model), lambda i, k: (0, 0)),        # b2
            ],
            out_specs=pl.BlockSpec((tile_m, d_model), lambda i, k: (i, 0)),
        ),
        compiler_params=pltpu.CompilerParams(
            dimension_semantics=("parallel", "arbitrary"),
            vmem_limit_bytes=vmem_limit,
        ),
        cost_estimate=cost,
    )(x2, w1, b1, w2, b2)


def positionwise_feed_forward(x, prepared):
    """x: [B, S, D] float32.  prepared: output of prepare_ffn_params()."""
    B, S, D = x.shape
    assert D == prepared["d_model"]
    M = B * S

    budget = _vmem_budget_bytes()
    tile_m, _ = _select_tiles(M, D, prepared["d_ff_padded"], budget)
    m_pad = _round_up(max(M, 8), tile_m)

    x2 = x.reshape(M, D).astype(jnp.float32)
    if m_pad != M:
        x2 = jnp.pad(x2, ((0, m_pad - M), (0, 0)))

    out = _ffn_call(x2, prepared["w1"], prepared["b1"],
                    prepared["w2"], prepared["b2"])
    return out[:M].reshape(B, S, D)


# --------------------------------------------------------------------------- #
# Plain-JAX reference (for correctness check)                                 #
# --------------------------------------------------------------------------- #
def reference(x, params):
    # Reference uses the same bf16-rounded weights so only activation /
    # matmul rounding differs from the kernel.
    w1 = params["w1"].astype(jnp.bfloat16).astype(jnp.float32)
    w2 = params["w2"].astype(jnp.bfloat16).astype(jnp.float32)
    b1 = params["b1"].astype(jnp.float32)
    b2 = params["b2"].astype(jnp.float32)
    h = jnp.maximum(x @ w1 + b1, 0.0)
    return h @ w2 + b2  # dropout is identity in eval mode


# --------------------------------------------------------------------------- #
if __name__ == "__main__":
    B, S, D, DFF = 2, 8, 32, 64

    key = jax.random.PRNGKey(0)
    k0, k1, k2, k3, k4 = jax.random.split(key, 5)

    x = jax.random.normal(k0, (B, S, D), jnp.float32)
    params = {
        "w1": jax.random.normal(k1, (D, DFF), jnp.float32) * 0.1,
        "b1": jax.random.normal(k2, (DFF,), jnp.float32) * 0.1,
        "w2": jax.random.normal(k3, (DFF, D), jnp.float32) * 0.1,
        "b2": jax.random.normal(k4, (D,), jnp.float32) * 0.1,
    }

    prepared = prepare_ffn_params(params)   # one-time bf16 cast + d_ff padding

    out = positionwise_feed_forward(x, prepared)
    out = jax.block_until_ready(out)

    ref = reference(x, params)
    max_err = float(jnp.max(jnp.abs(out - ref)))
    assert out.shape == (B, S, D), out.shape
    assert max_err < 3e-2, f"max abs err {max_err}"

    print("KERNEL_OK")
</pallas_src>

<mosaic_0001>
module attributes {stable_mosaic.version = 11 : i64} {
  func.func @_ffn_kernel(%arg0: i32, %arg1: i32, %arg2: memref<16x32xf32, #tpu.memory_space<vmem>>, %arg3: memref<32x128xbf16, #tpu.memory_space<vmem>>, %arg4: memref<1x128xf32, #tpu.memory_space<vmem>>, %arg5: memref<128x32xbf16, #tpu.memory_space<vmem>>, %arg6: memref<1x32xf32, #tpu.memory_space<vmem>>, %arg7: memref<16x32xf32, #tpu.memory_space<vmem>>) attributes {dimension_semantics = [#tpu.dimension_semantics<parallel>, #tpu.dimension_semantics<arbitrary>], iteration_bounds = array<i64: 1, 1>, scalar_prefetch = 0 : i64, scratch_operands = 0 : i64, tpu.core_type = #tpu.core_type<tc>, window_params = [{transform_indices = @transform_0, window_bounds = array<i64: 16, 32>}, {transform_indices = @transform_1, window_bounds = array<i64: 32, 128>}, {transform_indices = @transform_2, window_bounds = array<i64: 1, 128>}, {transform_indices = @transform_3, window_bounds = array<i64: 128, 32>}, {pipeline_mode = #tpu.pipeline_mode<synchronous>, transform_indices = @transform_4, window_bounds = array<i64: 1, 32>}, {transform_indices = @transform_5, window_bounds = array<i64: 16, 32>}]} {
    %c0 = arith.constant 0 : index
    %c0_0 = arith.constant 0 : index
    %0 = vector.load %arg2[%c0, %c0_0] : memref<16x32xf32, #tpu.memory_space<vmem>>, vector<16x32xf32>
    %1 = arith.truncf %0 : vector<16x32xf32> to vector<16x32xbf16>
    %c0_1 = arith.constant 0 : index
    %c0_2 = arith.constant 0 : index
    %2 = vector.load %arg3[%c0_1, %c0_2] : memref<32x128xbf16, #tpu.memory_space<vmem>>, vector<32x128xbf16>
    %cst = arith.constant dense<0.000000e+00> : vector<16x128xf32>
    %3 = tpu.matmul %1, %2, %cst {dimension_numbers = #tpu.dot_dimension_numbers<[1], [0], [0], [1], [0, 0, 1, 1], [], []>} : vector<16x32xbf16>, vector<32x128xbf16>, vector<16x128xf32> -> vector<16x128xf32>
    %c0_3 = arith.constant 0 : index
    %c0_4 = arith.constant 0 : index
    %4 = vector.load %arg4[%c0_3, %c0_4] : memref<1x128xf32, #tpu.memory_space<vmem>>, vector<1x128xf32>
    %5 = vector.broadcast %4 : vector<1x128xf32> to vector<16x128xf32>
    %6 = arith.addf %3, %5 : vector<16x128xf32>
    %cst_5 = arith.constant 0.000000e+00 : f32
    %7 = vector.broadcast %cst_5 : f32 to vector<16x128xf32>
    %8 = arith.maximumf %6, %7 : vector<16x128xf32>
    %9 = arith.truncf %8 : vector<16x128xf32> to vector<16x128xbf16>
    %c0_6 = arith.constant 0 : index
    %c0_7 = arith.constant 0 : index
    %10 = vector.load %arg5[%c0_6, %c0_7] : memref<128x32xbf16, #tpu.memory_space<vmem>>, vector<128x32xbf16>
    %cst_8 = arith.constant dense<0.000000e+00> : vector<16x32xf32>
    %11 = tpu.matmul %9, %10, %cst_8 {dimension_numbers = #tpu.dot_dimension_numbers<[1], [0], [0], [1], [0, 0, 1, 1], [], []>} : vector<16x128xbf16>, vector<128x32xbf16>, vector<16x32xf32> -> vector<16x32xf32>
    %c0_i32 = arith.constant 0 : i32
    %12 = arith.cmpi eq, %arg1, %c0_i32 : i32
    %13 = arith.extui %12 : i1 to i32
    %c0_i32_9 = arith.constant 0 : i32
    %14 = arith.cmpi ne, %13, %c0_i32_9 : i32
    scf.if %14 {
      %c0_14 = arith.constant 0 : index
      %c0_15 = arith.constant 0 : index
      %21 = vector.load %arg7[%c0_14, %c0_15] : memref<16x32xf32, #tpu.memory_space<vmem>>, vector<16x32xf32>
      tpu.vector_store %arg7[%c0_14, %c0_15], %11 {strides = array<i32>} : memref<16x32xf32, #tpu.memory_space<vmem>>, vector<16x32xf32>,
    } else {
    }
    %c0_i32_10 = arith.constant 0 : i32
    %15 = arith.cmpi ne, %arg1, %c0_i32_10 : i32
    %16 = arith.extui %15 : i1 to i32
    %c0_i32_11 = arith.constant 0 : i32
    %17 = arith.cmpi ne, %16, %c0_i32_11 : i32
    scf.if %17 {
      %c0_14 = arith.constant 0 : index
      %c0_15 = arith.constant 0 : index
      %21 = vector.load %arg7[%c0_14, %c0_15] : memref<16x32xf32, #tpu.memory_space<vmem>>, vector<16x32xf32>
      %22 = arith.addf %21, %11 : vector<16x32xf32>
      %c0_16 = arith.constant 0 : index
      %c0_17 = arith.constant 0 : index
      %23 = vector.load %arg7[%c0_16, %c0_17] : memref<16x32xf32, #tpu.memory_space<vmem>>, vector<16x32xf32>
      tpu.vector_store %arg7[%c0_16, %c0_17], %22 {strides = array<i32>} : memref<16x32xf32, #tpu.memory_space<vmem>>, vector<16x32xf32>,
    } else {
    }
    %c0_i32_12 = arith.constant 0 : i32
    %18 = arith.cmpi eq, %arg1, %c0_i32_12 : i32
    %19 = arith.extui %18 : i1 to i32
    %c0_i32_13 = arith.constant 0 : i32
    %20 = arith.cmpi ne, %19, %c0_i32_13 : i32
    scf.if %20 {
      %c0_14 = arith.constant 0 : index
      %c0_15 = arith.constant 0 : index
      %21 = vector.load %arg7[%c0_14, %c0_15] : memref<16x32xf32, #tpu.memory_space<vmem>>, vector<16x32xf32>
      %c0_16 = arith.constant 0 : index
      %c0_17 = arith.constant 0 : index
      %22 = vector.load %arg6[%c0_16, %c0_17] : memref<1x32xf32, #tpu.memory_space<vmem>>, vector<1x32xf32>
      %23 = vector.broadcast %22 : vector<1x32xf32> to vector<16x32xf32>
      %24 = arith.addf %21, %23 : vector<16x32xf32>
      %c0_18 = arith.constant 0 : index
      %c0_19 = arith.constant 0 : index
      %25 = vector.load %arg7[%c0_18, %c0_19] : memref<16x32xf32, #tpu.memory_space<vmem>>, vector<16x32xf32>
      tpu.vector_store %arg7[%c0_18, %c0_19], %24 {strides = array<i32>} : memref<16x32xf32, #tpu.memory_space<vmem>>, vector<16x32xf32>,
    } else {
    }
    return
  }
  func.func @transform_0(%arg0: i32, %arg1: i32) -> (i32, i32) {
    %c0_i32 = arith.constant 0 : i32
    %c0_i32_0 = arith.constant 0 : i32
    return %arg0, %c0_i32 : i32, i32
  }
  func.func @transform_1(%arg0: i32, %arg1: i32) -> (i32, i32) {
    %c0_i32 = arith.constant 0 : i32
    %c0_i32_0 = arith.constant 0 : i32
    return %c0_i32, %arg1 : i32, i32
  }
  func.func @transform_2(%arg0: i32, %arg1: i32) -> (i32, i32) {
    %c0_i32 = arith.constant 0 : i32
    %c0_i32_0 = arith.constant 0 : i32
    return %c0_i32, %arg1 : i32, i32
  }
  func.func @transform_3(%arg0: i32, %arg1: i32) -> (i32, i32) {
    %c0_i32 = arith.constant 0 : i32
    %c0_i32_0 = arith.constant 0 : i32
    return %arg1, %c0_i32 : i32, i32
  }
  func.func @transform_4(%arg0: i32, %arg1: i32) -> (i32, i32) {
    %c0_i32 = arith.constant 0 : i32
    %c0_i32_0 = arith.constant 0 : i32
    %c0_i32_1 = arith.constant 0 : i32
    return %c0_i32, %c0_i32_0 : i32, i32
  }
  func.func @transform_5(%arg0: i32, %arg1: i32) -> (i32, i32) {
    %c0_i32 = arith.constant 0 : i32
    %c0_i32_0 = arith.constant 0 : i32
    return %arg0, %c0_i32 : i32, i32
  }
}

</mosaic_0001>

<bundles_post_ra>
// kernel: _ffn_call.1
= control target key start
LH: loop header
LB: loop body
LE: loop exit
PB: predicated region body
PF: predicated region fallthrough
CT: control target
= control target key end

     0   :  { %s356_s0 = inlined_call_operand.vmem [shape: f32[16,32], index: 0, kind: input, shape index: {}]   ;;  %s357_s1 = inlined_call_operand.vmem [shape: bf16[32,128], index: 1, kind: input, shape index: {}]   ;;  %s358_s2 = inlined_call_operand.vmem [shape: f32[1,128], index: 2, kind: input, shape index: {}]   ;;  %s359_s3 = inlined_call_operand.vmem [shape: bf16[128,32], index: 3, kind: input, shape index: {}]   ;;  %s360_s4 = inlined_call_operand.vmem [shape: f32[1,32], index: 4, kind: input, shape index: {}]   ;;  %s361_s5 = inlined_call_operand.hbm [shape: f32[16,32], index: 5, kind: output, shape index: {}]  }
   0x1   :  { %v233_v0 = vld [vmem:[%s357_s1 + $0x8] sm:$0xff]  ;;  %v232_v1 = vld [vmem:[%s357_s1] sm:$0xff]  ;;  %v241_v2 = vld [vmem:[%s359_s3 + $0x38] sm:$0xff] }
   0x2   :  { %55 = vmatpush.bf16.msra.mxu0 %v233_v0  ;;  %v22_v3 = vld [vmem:[%s356_s0] sm:$0xff]  ;;  %v23_v4 = vld [vmem:[%s356_s0 + $0x8] sm:$0xff]  ;;  %130 = vmatpush.bf16.msra.mxu1 %v241_v2  ;;  %v240_v5 = vld [vmem:[%s359_s3 + $0x30] sm:$0xff] }
   0x3   :  { %10 = vsyncpa [#allocation3], 0  ;;  %v24_v6 = vpack.c.bf16 %v23_v4, %v22_v3  ;;  %vm45_vm0 = vcmask 261120   ;;  %v239_v7 = vld [vmem:[%s359_s3 + $0x28] sm:$0xff]  ;;  %v238_v8 = vld [vmem:[%s359_s3 + $0x20] sm:$0xff]  ;;  %s179_s21 = sshll.u32 %s361_s5, 4  ;;  %s180_s21 = int_to_ptr.hbm [resolvable:$true] %s179_s21 }
   0x4   :  { %v237_v9 = vld [vmem:[%s359_s3 + $0x18] sm:$0xff]  ;;  %v236_v10 = vld [vmem:[%s359_s3 + $0x10] sm:$0xff]  ;;  %v235_v11 = vld [vmem:[%s359_s3 + $0x8] sm:$0xff]  ;;  %s275_s22 = smov 8  }
   0x5   :  { %v234_v12 = vld [vmem:[%s359_s3] sm:$0xff] }
   0x6   :  { %56 = vmatpush.bf16.msra.mxu0 %v232_v1  ;;  %131 = vmatpush.bf16.msra.mxu1 %v240_v5  ;;  %v245_v14 = vld [vmem:[%s358_s2] ss:$0 sm:$0xff]  ;;  %s273_s2 = smov [#allocation2]  }
   0x7   :  { %v246_v22 = vld [vmem:[%s360_s4] ss:$0 sm:$0xff]  ;;  %s177_s3 = sshll.u32 %s273_s2, 4  ;;  %s274_s4 = smov 128   ;;  %s178_s3 = int_to_ptr.vmem [resolvable:$true] %s177_s3 }
   0x9   :  { %199 = vmatmul.msk.bf16.vlgmr.msra.gmra.mxu0 %vm45_vm0, %v24_v6 }
   0xa   :  { %132 = vmatpush.bf16.msra.mxu1 %v239_v7 }
   0xe   :  { %133 = vmatpush.bf16.msra.mxu1 %v238_v8 }
  0x12   :  { %134 = vmatpush.bf16.msra.mxu1 %v237_v9 }
  0x16   :  { %135 = vmatpush.bf16.msra.mxu1 %v236_v10 }
  0x1a   :  { %136 = vmatpush.bf16.msra.mxu1 %v235_v11 }
  0x1e   :  { %137 = vmatpush.bf16.msra.mxu1 %v234_v12 }
  0x86   :  { %v58_v13 = vpop.f32.mrf.mxu0 }
  0x87   :  { %v59_v15 = vadd.f32 %v245_v14, %v58_v13 }
  0x89   :  { %v63_v18 = vmax.f32 %v59_v15, 0.0 }
  0x8e   :  { %v60_v16 = vpop.f32.mrf.mxu0 }
  0x8f   :  { %v61_v17 = vadd.f32 %v245_v14, %v60_v16 }
  0x91   :  { %v64_v19 = vmax.f32 %v61_v17, 0.0 }
  0x93   :  { %v65_v20 = vpack.c.bf16 %v64_v19, %v63_v18 }
  0x95   :  { %138 = vmatmul.bf16.vlgmr.msra.gmra.mxu1 %v65_v20 }
 0x112   :  { %v139_v21 = vpop.f32.mrf.mxu1 }
 0x113   :  { %148 = vst.msk [vmem:[#allocation2] sm:$0xff] %vm45_vm0, %v139_v21 }
 0x11a   :  { %v163_v23 = vld [vmem:[#allocation2] sm:$0xff]  ;;  %v141_v24 = vpop.f32.mrf.mxu1 }
 0x11b   :  { %v169_v25 = vadd.f32 %v246_v22, %v163_v23  ;;  %149 = vst.msk [vmem:[#allocation2 + $0x8] sm:$0xff] %vm45_vm0, %v141_v24 }
 0x11d   :  { %171 = vst.msk [vmem:[#allocation2] sm:$0xff] %vm45_vm0, %v169_v25 }
 0x122   :  { %v164_v26 = vld [vmem:[#allocation2 + $0x8] sm:$0xff] }
 0x123   :  { %v170_v27 = vadd.f32 %v246_v22, %v164_v26 }
 0x125   :  { %172 = vst.msk [vmem:[#allocation2 + $0x8] sm:$0xff] %vm45_vm0, %v170_v27 }
 0x126   :  { %185 = dma.vmem_to_hbm [thread:$0]  %s178_s3, 256, %s180_s21, [#allocation3], %s274_s4, %s274_s4, %s275_s22  }
 0x127   :  { %271 = dma.done.wait [#allocation3], 256  }
 0x128   :  { %272 = vsyncadd [#allocation3], 4294967040 }
 0x129   :  { %190 = vsyncpa [#allocation3], 1 }

</bundles_post_ra>
